<compile_context>
chip_gen: v7x
topology: tpu7x:2x2x1
jax: 0.10.0
libtpu: 0.0.40
codegen_flags: <defaults>
</compile_context>

<pallas_src>
import functools

import jax
import jax.numpy as jnp
from jax.experimental import pallas as pl
from jax.experimental.pallas import tpu as pltpu


# ----------------------------------------------------------------------------
# small helpers
# ----------------------------------------------------------------------------
def _round_up(x, m):
    return (x + m - 1) // m * m


def _pick_tile(dim_pad, cap, prefer_split=False):
    """Largest multiple of 128 that divides `dim_pad` (itself a multiple of 128)
    and is <= cap.  With prefer_split, also require >= 2 blocks when possible so
    megacore has >= 2 W-column blocks to shard across TensorCores."""
    n = dim_pad // 128
    cap_u = max(1, cap // 128)
    if prefer_split and n >= 2:
        cap_u = min(cap_u, max(1, n // 2))
    best = 1
    for d in range(1, cap_u + 1):
        if n % d == 0:
            best = d
    return best * 128


_VMEM_CAPS = None


def _vmem_budget_and_limit():
    """Per-generation (budget, vmem_limit_bytes): ~70% / 85% of per-core VMEM.
    Falls back to the v7x 64 MiB floor if the query is unavailable."""
    global _VMEM_CAPS
    if _VMEM_CAPS is None:
        try:
            cap = int(pltpu.get_tpu_info().vmem_capacity_bytes)
            if cap <= 0:
                raise ValueError("bad vmem capacity")
        except Exception:
            cap = 64 << 20
        _VMEM_CAPS = (int(cap * 0.70), int(cap * 0.85))
    return _VMEM_CAPS


def _plan_tm(nc, q_pad, tn, tk, itemsize, budget):
    """Pick the M tile from the VMEM budget.

    Double-buffered operand footprints:
      feat resident: 2 * tm * q_pad * itemsize   (whole K strip in VMEM)
      feat streamed: 2 * tm * tk   * itemsize
      W:             2 * tk * tn   * itemsize
      out (f32):     2 * tm * tn   * 4
    Returns (tm, nc_pad, feat_resident)."""
    sub = 8 if itemsize >= 4 else 32 // itemsize   # f32: 8, bf16: 16, int8/fp8: 32
    nc_sub = _round_up(nc, sub)
    w_buf = 2 * tk * tn * itemsize
    avail = max(0, budget - w_buf)

    per_tm_res = 2 * q_pad * itemsize + 2 * tn * 4
    tm_res = (avail // per_tm_res) // sub * sub
    if tm_res >= min(256, nc_sub):
        tm = min(tm_res, nc_sub)
        return tm, _round_up(nc, tm), True

    # Feat K-strip does not fit at a useful tm (huge Q, e.g. under v7x's
    # 64 MiB VMEM): stream feat K-tiles like W instead.
    per_tm_str = 2 * tk * itemsize + 2 * tn * 4
    tm_str = max(sub, (avail // per_tm_str) // sub * sub)
    tm = max(sub, min(tm_str, nc_sub))
    return tm, _round_up(nc, tm), False


# ----------------------------------------------------------------------------
# Parameter setup (mirrors SpatialTransfomerFixedOffset.generate_homo_offset)
# ----------------------------------------------------------------------------
def generate_homo_offset(homography, height, width, eps=1e-7):
    """homography: (1, 3, 3) -> offset grid (1, H, W, 2) in pixel units."""
    y, x = jnp.meshgrid(jnp.arange(height), jnp.arange(width), indexing="ij")
    id_coords = jnp.stack([x, y], axis=0).astype(jnp.float32)          # (2, H, W)
    ones = jnp.ones((1, height, width), jnp.float32)
    pix_coords = jnp.concatenate([id_coords, ones], axis=0).reshape(1, 3, -1)
    cam_points = jnp.matmul(homography, pix_coords)                    # (1, 3, H*W)
    new_pix = cam_points[:, :2, :] / (cam_points[:, 2:3, :] + eps)
    homo_offset = new_pix - pix_coords[:, :2, :]
    homo_offset = homo_offset.reshape(-1, 2, height, width)
    homo_offset = jnp.transpose(homo_offset, (0, 2, 3, 1))             # (1, H, W, 2)
    return homo_offset


def build_bilinear_weight_matrix(offset, h_in, w_in):
    """Fold bilinear grid_sample (pixel-offset grid, zeros padding) into a dense
    (Q = h_in*w_in, P = h_out*w_out) f32 matrix.  Runs once at setup."""
    h_out, w_out = offset.shape[1], offset.shape[2]
    base_x, base_y = jnp.meshgrid(
        jnp.arange(w_out, dtype=jnp.float32),
        jnp.arange(h_out, dtype=jnp.float32),
        indexing="xy",
    )
    sx = base_x + offset[0, ..., 0]
    sy = base_y + offset[0, ..., 1]

    x0 = jnp.floor(sx)
    y0 = jnp.floor(sy)
    x1 = x0 + 1.0
    y1 = y0 + 1.0
    wx1 = sx - x0
    wx0 = 1.0 - wx1
    wy1 = sy - y0
    wy0 = 1.0 - wy1

    q_size = h_in * w_in
    p_size = h_out * w_out
    p_idx = jnp.arange(p_size, dtype=jnp.int32)

    w_mat = jnp.zeros((q_size, p_size), jnp.float32)
    for xc, yc, wgt in (
        (x0, y0, wx0 * wy0),
        (x1, y0, wx1 * wy0),
        (x0, y1, wx0 * wy1),
        (x1, y1, wx1 * wy1),
    ):
        valid = (xc >= 0) & (xc <= w_in - 1) & (yc >= 0) & (yc <= h_in - 1)
        q = yc.astype(jnp.int32) * w_in + xc.astype(jnp.int32)
        # OOB corners: remap to index 0 but force weight to exactly 0
        # ('zeros' padding semantics).
        q = jnp.where(valid, q, 0).reshape(-1)
        wv = jnp.where(valid, wgt, 0.0).reshape(-1)
        w_mat = w_mat.at[q, p_idx].add(wv)
    return w_mat  # (Q, P) f32


# ----------------------------------------------------------------------------
# Pallas kernel: tiled matmul  out[NC, P] = feat[NC, Q] @ W[Q, P]
# ----------------------------------------------------------------------------
def _sample_matmul_kernel(feat_ref, w_ref, out_ref, *, tk, feat_resident):
    k = pl.program_id(2)
    if feat_resident:
        start = pl.multiple_of(k * tk, tk)
        a = feat_ref[:, pl.ds(start, tk)]
    else:
        a = feat_ref[...]
    part = jnp.dot(a, w_ref[...], preferred_element_type=jnp.float32)

    @pl.when(k == 0)
    def _():
        out_ref[...] = part          # direct write: no zero-init RMW

    @pl.when(k > 0)
    def _():
        out_ref[...] += part


@functools.partial(
    jax.jit,
    static_argnames=("p", "tm", "nc_pad", "feat_resident", "j_leading",
                     "vmem_limit_bytes"),
)
def _sample_matmul(feat2d, w_tiled, *, p, tm, nc_pad, feat_resident, j_leading,
                   vmem_limit_bytes):
    nc, q = feat2d.shape
    nk, nj, tk, tn = w_tiled.shape
    q_pad, p_pad = nk * tk, nj * tn
    cdt = w_tiled.dtype
    itemsize = cdt.itemsize
    out_dtype = feat2d.dtype

    feat_p = feat2d.astype(cdt)
    if nc_pad != nc or q_pad != q:
        feat_p = jnp.pad(feat_p, ((0, nc_pad - nc), (0, q_pad - q)))

    num_i = nc_pad // tm

    if feat_resident:
        feat_block = (tm, q_pad)
        feat_idx = (lambda j, i, k: (i, 0)) if j_leading else (lambda i, j, k: (i, 0))
    else:
        feat_block = (tm, tk)
        feat_idx = (lambda j, i, k: (i, k)) if j_leading else (lambda i, j, k: (i, k))

    if j_leading:
        grid = (nj, num_i, nk)
        w_idx = lambda j, i, k: (k, j, 0, 0)
        out_idx = lambda j, i, k: (i, j)
    else:
        grid = (num_i, nj, nk)
        w_idx = lambda i, j, k: (k, j, 0, 0)
        out_idx = lambda i, j, k: (i, j)

    cost = pl.CostEstimate(
        flops=2 * nc_pad * q_pad * p_pad,
        transcendentals=0,
        bytes_accessed=int(
            nc_pad * q_pad * itemsize              # feat
            + num_i * q_pad * p_pad * itemsize     # W, re-streamed per M block
            + nc_pad * p_pad * 4                   # f32 output writeback
        ),
    )

    out = pl.pallas_call(
        functools.partial(_sample_matmul_kernel, tk=tk, feat_resident=feat_resident),
        out_shape=jax.ShapeDtypeStruct((nc_pad, p_pad), jnp.float32),
        grid_spec=pltpu.PrefetchScalarGridSpec(
            num_scalar_prefetch=0,
            grid=grid,
            in_specs=[
                pl.BlockSpec(feat_block, feat_idx),
                # W is pre-tiled (nk, nj, tk, tn): each block DMA is contiguous.
                pl.BlockSpec((None, None, tk, tn), w_idx),
            ],
            out_specs=pl.BlockSpec((tm, tn), out_idx),
        ),
        compiler_params=pltpu.CompilerParams(
            dimension_semantics=("parallel", "parallel", "arbitrary"),
            vmem_limit_bytes=vmem_limit_bytes,
        ),
        cost_estimate=cost,
    )(feat_p, w_tiled)

    return out[:nc, :p].astype(out_dtype)


# ----------------------------------------------------------------------------
# Module
# ----------------------------------------------------------------------------
class SpatialTransformerFixedOffset:
    """JAX/Pallas port of SpatialTransfomerFixedOffset (bilinear, zeros padding).

    The sampling matrix W is built, padded and pre-tiled once (here, at
    construction / first sight of a feature spatial size), never on the
    per-forward path."""

    def __init__(self, height, width, homography=None, homo_offset=None,
                 grid_quant_scale=None, mode="bilinear", padding_mode="zeros",
                 eps=1e-7, feature_size=None, compute_dtype=jnp.bfloat16,
                 tn_cap=1024, tk_cap=512):
        if mode != "bilinear":
            raise NotImplementedError("only bilinear grid_sample is implemented")
        if padding_mode != "zeros":
            raise NotImplementedError("only zeros padding is implemented")
        del grid_quant_scale  # TODO(synk): qint16 fake-quant is identity in float mode.
        self.height = int(height)
        self.width = int(width)
        self.eps = float(eps)
        self.compute_dtype = jnp.dtype(compute_dtype)
        self.tn_cap = int(tn_cap)
        self.tk_cap = int(tk_cap)

        if homo_offset is not None:
            off = jnp.asarray(homo_offset, jnp.float32)
            if off.ndim == 3:
                off = off[None]
        elif homography is not None:
            off = generate_homo_offset(
                jnp.asarray(homography, jnp.float32), self.height, self.width,
                eps=self.eps)
        else:
            raise ValueError("only one of (homo_offset, homography) should be None")
        self.offset = off                       # (1, H_grid, W_grid, 2), pixel units

        self._plans = {}
        if feature_size is None:
            feature_size = (self.height, self.width)
        self._get_plan(*feature_size)           # hoist the W build out of forward

    # -- one-time per feature spatial size ------------------------------------
    def _get_plan(self, h_in, w_in):
        key = (int(h_in), int(w_in))
        plan = self._plans.get(key)
        if plan is not None:
            return plan

        q = key[0] * key[1]
        p = self.height * self.width
        w_mat = build_bilinear_weight_matrix(self.offset, key[0], key[1])  # (Q, P)

        q_pad = _round_up(q, 128)
        p_pad = _round_up(p, 128)
        tk = _pick_tile(q_pad, self.tk_cap)
        tn = _pick_tile(p_pad, self.tn_cap, prefer_split=True)

        w_pad = w_mat.astype(self.compute_dtype)
        if (q_pad - q) or (p_pad - p):
            w_pad = jnp.pad(w_pad, ((0, q_pad - q), (0, p_pad - p)))
        # Pre-tile the fixed parameter: (nk, nj, tk, tn), contiguous per block.
        w_tiled = w_pad.reshape(q_pad // tk, tk, p_pad // tn, tn).transpose(0, 2, 1, 3)
        w_tiled = jax.block_until_ready(w_tiled)

        plan = {"w_tiled": w_tiled, "q": q, "p": p, "tk": tk, "tn": tn,
                "q_pad": q_pad, "p_pad": p_pad}
        self._plans[key] = plan
        return plan

    # -- per-forward hot path --------------------------------------------------
    def __call__(self, feature):
        n, c, h, w = feature.shape
        plan = self._get_plan(h, w)
        nc = n * c
        itemsize = self.compute_dtype.itemsize

        budget, vmem_limit = _vmem_budget_and_limit()
        tm, nc_pad, feat_resident = _plan_tm(
            nc, plan["q_pad"], plan["tn"], plan["tk"], itemsize, budget)
        num_i = nc_pad // tm
        nj = plan["p_pad"] // plan["tn"]

        # Put the W-column axis (j) leading when feat re-streaming across j is
        # cheap, so megacore (v7x) shards disjoint W columns across both cores.
        feat_bytes = nc_pad * plan["q_pad"] * itemsize
        w_bytes = plan["q_pad"] * plan["p_pad"] * itemsize
        j_leading = (num_i == 1) or ((nj - 1) * feat_bytes <= (num_i * w_bytes) // 4)

        feat2d = feature.reshape(nc, h * w)
        out2d = _sample_matmul(
            feat2d, plan["w_tiled"], p=plan["p"], tm=tm, nc_pad=nc_pad,
            feat_resident=feat_resident, j_leading=j_leading,
            vmem_limit_bytes=vmem_limit)
        return out2d.reshape(n, c, self.height, self.width)


# ----------------------------------------------------------------------------
# Pure-JAX reference (direct bilinear gather) for correctness check
# ----------------------------------------------------------------------------
def ref_grid_sample_offset(feature, offset):
    n, c, h, w = feature.shape
    h_out, w_out = offset.shape[1], offset.shape[2]
    base_x, base_y = jnp.meshgrid(
        jnp.arange(w_out, dtype=jnp.float32),
        jnp.arange(h_out, dtype=jnp.float32),
        indexing="xy",
    )
    sx = base_x + offset[0, ..., 0]
    sy = base_y + offset[0, ..., 1]
    x0 = jnp.floor(sx)
    y0 = jnp.floor(sy)
    x1 = x0 + 1.0
    y1 = y0 + 1.0
    wx1 = sx - x0
    wx0 = 1.0 - wx1
    wy1 = sy - y0
    wy0 = 1.0 - wy1

    def tap(xc, yc, wgt):
        valid = (xc >= 0) & (xc <= w - 1) & (yc >= 0) & (yc <= h - 1)
        xi = jnp.clip(xc.astype(jnp.int32), 0, w - 1)
        yi = jnp.clip(yc.astype(jnp.int32), 0, h - 1)
        vals = feature[:, :, yi, xi]                 # (N, C, H_out, W_out)
        return vals * (wgt * valid.astype(jnp.float32))[None, None]

    return (
        tap(x0, y0, wx0 * wy0)
        + tap(x1, y0, wx1 * wy0)
        + tap(x0, y1, wx0 * wy1)
        + tap(x1, y1, wx1 * wy1)
    )


if __name__ == "__main__":
    key = jax.random.PRNGKey(0)

    N, C, H, W = 2, 4, 16, 16          # grid height/width == feature H/W
    feature = jax.random.normal(key, (N, C, H, W), dtype=jnp.float32)

    # Deterministic "homography" parameter: near-identity projective warp.
    homography = jnp.array(
        [[[1.00, 0.05, 1.50],
          [-0.03, 1.00, -0.70],
          [0.0005, -0.0003, 1.00]]],
        dtype=jnp.float32,
    )

    ref_offset = generate_homo_offset(homography, H, W)   # (1, H, W, 2)
    ref = ref_grid_sample_offset(feature, ref_offset)

    # Exact path (f32 operands) — tight tolerance.
    st_f32 = SpatialTransformerFixedOffset(
        H, W, homography=homography, compute_dtype=jnp.float32)
    out_f32 = jax.block_until_ready(st_f32(feature))
    assert out_f32.shape == (N, C, H, W)
    assert float(jnp.max(jnp.abs(out_f32 - ref))) < 2e-3, "f32 path mismatch"

    # Default fast path: bf16 operands (halved W HBM traffic), f32 accumulation.
    st = SpatialTransformerFixedOffset(H, W, homography=homography)
    out = jax.block_until_ready(st(feature))
    assert out.shape == (N, C, H, W)
    assert float(jnp.max(jnp.abs(out - ref))) < 1e-1, "bf16 path mismatch"

    # Second forward hits the cached plan (no W rebuild) and the jit cache.
    out2 = jax.block_until_ready(st(feature))
    assert float(jnp.max(jnp.abs(out2 - out))) == 0.0

    print("KERNEL_OK")
</pallas_src>

<mosaic_0001>
module attributes {stable_mosaic.version = 11 : i64} {
  func.func @_sample_matmul_kernel(%arg0: i32, %arg1: i32, %arg2: i32, %arg3: memref<8x256xf32, #tpu.memory_space<vmem>>, %arg4: memref<1x1x256x128xf32, #tpu.memory_space<vmem>>, %arg5: memref<8x128xf32, #tpu.memory_space<vmem>>) attributes {dimension_semantics = [#tpu.dimension_semantics<parallel>, #tpu.dimension_semantics<parallel>, #tpu.dimension_semantics<arbitrary>], iteration_bounds = array<i64: 2, 1, 1>, scalar_prefetch = 0 : i64, scratch_operands = 0 : i64, tpu.core_type = #tpu.core_type<tc>, window_params = [{transform_indices = @transform_0, window_bounds = array<i64: 8, 256>}, {transform_indices = @transform_1, window_bounds = array<i64: 1, 1, 256, 128>}, {transform_indices = @transform_2, window_bounds = array<i64: 8, 128>}]} {
    %c256_i32 = arith.constant 256 : i32
    %0 = arith.muli %arg2, %c256_i32 : i32
    %1 = tpu.assume_multiple %0, 256 : i32
    %c0 = arith.constant 0 : index
    %2 = arith.index_cast %1 : i32 to index
    %3 = vector.load %arg3[%c0, %2] : memref<8x256xf32, #tpu.memory_space<vmem>>, vector<8x256xf32>
    %c0_0 = arith.constant 0 : index
    %c0_1 = arith.constant 0 : index
    %c0_2 = arith.constant 0 : index
    %c0_3 = arith.constant 0 : index
    %4 = vector.load %arg4[%c0_0, %c0_1, %c0_2, %c0_3] : memref<1x1x256x128xf32, #tpu.memory_space<vmem>>, vector<1x1x256x128xf32>
    %5 = vector.shape_cast %4 : vector<1x1x256x128xf32> to vector<256x128xf32>
    %cst = arith.constant dense<0.000000e+00> : vector<8x128xf32>
    %6 = tpu.matmul %3, %5, %cst {dimension_numbers = #tpu.dot_dimension_numbers<[1], [0], [0], [1], [0, 0, 1, 1], [], []>} : vector<8x256xf32>, vector<256x128xf32>, vector<8x128xf32> -> vector<8x128xf32>
    %c0_i32 = arith.constant 0 : i32
    %7 = arith.cmpi eq, %arg2, %c0_i32 : i32
    %8 = arith.extui %7 : i1 to i32
    %c0_i32_4 = arith.constant 0 : i32
    %9 = arith.cmpi ne, %8, %c0_i32_4 : i32
    scf.if %9 {
      %c0_7 = arith.constant 0 : index
      %c0_8 = arith.constant 0 : index
      %13 = vector.load %arg5[%c0_7, %c0_8] : memref<8x128xf32, #tpu.memory_space<vmem>>, vector<8x128xf32>
      tpu.vector_store %arg5[%c0_7, %c0_8], %6 {strides = array<i32>} : memref<8x128xf32, #tpu.memory_space<vmem>>, vector<8x128xf32>,
    } else {
    }
    %c0_i32_5 = arith.constant 0 : i32
    %10 = arith.cmpi sgt, %arg2, %c0_i32_5 : i32
    %11 = arith.extui %10 : i1 to i32
    %c0_i32_6 = arith.constant 0 : i32
    %12 = arith.cmpi ne, %11, %c0_i32_6 : i32
    scf.if %12 {
      %c0_7 = arith.constant 0 : index
      %c0_8 = arith.constant 0 : index
      %13 = vector.load %arg5[%c0_7, %c0_8] : memref<8x128xf32, #tpu.memory_space<vmem>>, vector<8x128xf32>
      %14 = arith.addf %13, %6 : vector<8x128xf32>
      %c0_9 = arith.constant 0 : index
      %c0_10 = arith.constant 0 : index
      %15 = vector.load %arg5[%c0_9, %c0_10] : memref<8x128xf32, #tpu.memory_space<vmem>>, vector<8x128xf32>
      tpu.vector_store %arg5[%c0_9, %c0_10], %14 {strides = array<i32>} : memref<8x128xf32, #tpu.memory_space<vmem>>, vector<8x128xf32>,
    } else {
    }
    return
  }
  func.func @transform_0(%arg0: i32, %arg1: i32, %arg2: i32) -> (i32, i32) {
    %c0_i32 = arith.constant 0 : i32
    %c0_i32_0 = arith.constant 0 : i32
    return %arg1, %c0_i32 : i32, i32
  }
  func.func @transform_1(%arg0: i32, %arg1: i32, %arg2: i32) -> (i32, i32, i32, i32) {
    %c0_i32 = arith.constant 0 : i32
    %c0_i32_0 = arith.constant 0 : i32
    %c0_i32_1 = arith.constant 0 : i32
    return %arg2, %arg0, %c0_i32, %c0_i32_0 : i32, i32, i32, i32
  }
  func.func @transform_2(%arg0: i32, %arg1: i32, %arg2: i32) -> (i32, i32) {
    %c0_i32 = arith.constant 0 : i32
    return %arg1, %arg0 : i32, i32
  }
}

</mosaic_0001>

<bundles_post_ra>
// kernel: _sample_matmul.1
= control target key start
LH: loop header
LB: loop body
LE: loop exit
PB: predicated region body
PF: predicated region fallthrough
CT: control target
= control target key end

     0   :  { %7 = vsyncpa [#allocation3], 0  ;;  %s1026_s0 = inlined_call_operand.hbm [shape: f32[8,256], index: 0, kind: input, shape index: {}]   ;;  %s1027_s1 = inlined_call_operand.hbm [shape: f32[1,2,256,128], index: 1, kind: input, shape index: {}]   ;;  %s1028_s2 = inlined_call_operand.hbm [shape: f32[8,256], index: 2, kind: output, shape index: {}]  }
   0x1   :  { %8 = vsyncpa [#allocation6], 0 }
   0x2   :  { %10 = vsyncpa [#allocation6 + $0x1], 0 }
   0x3   :  { %11 = vsyncpa [#allocation4], 0 }
   0x4   :  { %13 = vsyncpa [#allocation4 + $0x1], 0  ;;  %s772_s9 = smov 0   ;;  %s774_s10 = smov 0  }
   0x5   :  { %s776_s11 = smov 0   ;;  %s778_s12 = smov 0  }
   0x6   :  { %s780_s13 = smov 0   ;;  %s782_s14 = smov 0  }
   0x7 LB: > { %s447_s15 = sadd.s32 4294967295, %s750_s14   ;;  %s448_s16 = sadd.s32 4294967294, %s750_s14   ;;  %s750_s14 = sphi %s782_s14, %s19_s14   ;;  %s746_s13 = sphi %s780_s13, %s1056_s13   ;;  %s742_s12 = sphi %s778_s12, %s1055_s12   ;;  %s738_s11 = sphi %s776_s11, %s1054_s11   ;;  %s734_s10 = sphi %s774_s10, %s1053_s10   ;;  %s730_s9 = sphi %s772_s9, %s1052_s9  }
   0x8   : > { %s73_s17 = sadd.s32 1, %s738_s11  ;;  %p80_p0 = scmp.ne.s32.totalorder %s738_s11, %s734_s10 }
   0x9   : > { %p81_p1 = scmp.eq.s32.totalorder %s750_s14, 0  ;;  %p86_p2 = scmp.ne.s32.totalorder %s734_s10, %s730_s9 }
   0xa   : > { %p810_p3 = scmp.eq.s32.totalorder %s447_s15, 0  ;;  %p112_p4 = scmp.eq.s32.totalorder %s447_s15, 1 }
   0xb   : > { %p814_p5 = por %p81_p1, %p80_p0  ;;  %p118_p6 = scmp.eq.s32.totalorder %s448_s16, 1 }
   0xc   : > { %s1035_s18 = scalar_select %p810_p3, 1, 0 }
   0xd   : > { %p820_p7 = por %p810_p3, %p86_p2  ;;  %p824_p8 = por %p112_p4, %p80_p0 }
   0xe   : > { %p828_p9 = por %p118_p6, %p86_p2  ;;  %p449_p10 = scmp.ge.s32.totalorder %s750_s14, 1 }
   0xf   : > { %s1037_s20 = scalar_select %p820_p7, 1, 0 }
  0x10   : > { %s1038_s21 = scalar_select %p824_p8, 1, 0 }
  0x11   : > { %s1039_s22 = scalar_select %p828_p9, 1, 0 }
  0x12   : > { %p125_p11 = scmp.lt.s32.totalorder %s750_s14, 3  ;;  %s752_s24 = smov [#allocation2]  }
  0x13   : > { %s141_s25 = sshll.u32 %s752_s24, 4  ;;  %p552_p1 = scmp.lt.s32.totalorder %s750_s14, 2  ;;  %s142_s25 = int_to_ptr.vmem [resolvable:$true] %s141_s25 }
  0x14   : > { %p835_p13 = pnand %p449_p10, %p125_p11  ;;  %s38_s28 = sadd.s32 1, %s746_s13 }
  0x15   : > { %p844_p4 = pnand %p552_p1, %p814_p5  ;;  %p855_p6 = scmp.ge.s32.totalorder %s38_s28, 2 }
  0x16   : > { %s1040_s23 = scalar_select %p835_p13, 1, 0 }
  0x17   : > { %p539_p0 = pneg %p835_p13  ;;  %s152_s30 = sand.u32 1, %s738_s11  }
  0x18   : > { %s1041_s26 = scalar_select %p844_p4, 1, 0 }
  0x19   : > { %p850_p2 = pnand %p539_p0, %p810_p3  ;;  %s606_s5 = scalar_lea.hbm %s1026_s0, 256 }
  0x1a   : > { %s1043_s29 = scalar_select %p855_p6, 1, 0 }
  0x1b   : > { %p607_p5 = scmp.ne.s32.totalorder %s1026_s0, %s606_s5  ;;  %p608_p10 = pneg %p850_p2 }
  0x1c   : > { %p613_p0 = scmp.lt.u32.totalorder %s606_s5, %s1026_s0 }
  0x1d   : > { %p609_p11 = pnand %p608_p10, %p607_p5 }
  0x1f   : > { %p610_p1 = pneg %p609_p11 }
  0x21   : > { %p615_p12 = pnand %p613_p0, %p610_p1 }
  0x23   : > { %618 = shalt.err (!%p615_p12)
}
  0x24   : > { %s619_s16 = scalar_lea.vmem %s142_s25, 256  ;;  %p627_p3 = scmp.lt.s32.totalorder %s142_s25, %s142_s25 }
  0x25   : > { %p620_p9 = scmp.ne.s32.totalorder %s142_s25, %s619_s16  ;;  %p628_p13 = scmp.lt.s32.totalorder %s619_s16, %s619_s16 }
  0x27   : > { %p622_p8 = pnand %p620_p9, %p608_p10  ;;  %p629_p4 = por %p628_p13, %p627_p3 }
  0x29   : > { %p623_p7 = pneg %p622_p8 }
  0x2b   : > { %p630_p6 = pnand %p629_p4, %p623_p7 }
  0x2d   : > { %633 = shalt.err (!%p630_p6)
}
  0x2e   : > { %542 = dma.hbm_to_vmem [thread:$0]  (!%p850_p2), %s1026_s0, 256, %s142_s25, [#allocation3]  }
  0x2f   : > { %p1044_p9 = scmp.ne.s32.totalorder %s1043_s29, 0  ;;  %s452_s3 = sshll.u32 %s152_s30, 8 }
  0x30   : > { %s463_s5 = sshll.u32 %s746_s13, 12  ;;  %s156_s8 = scalar_lea.vmem [#allocation5], %s452_s3 }
  0x31   : > { %s1058_s28 = smov (%p1044_p9, %s38_s28), 0  ;;  %s886_s7 = scalar_lea.hbm %s1027_s1, %s463_s5 }
  0x32   : > { %s69_s4 = ssub.s32 %s746_s13, %s1058_s28  ;;  %s165_s15 = sshll.u32 %s156_s8, 4  ;;  %s893_s15 = int_to_ptr.vmem [resolvable:$true] %s165_s15 }
  0x33   : > { %p71_p3 = scmp.eq.s32.totalorder %s69_s4, 0  ;;  %s895_s29 = scalar_lea.sflag [#allocation6], %s152_s30 }
  0x34   : > { %s634_s16 = scalar_lea.hbm %s886_s7, 4096  ;;  %p1045_p8 = scmp.ne.s32.totalorder %s1041_s26, 0 }
  0x35   : > { %s891_s25 = scalar_select %p71_p3, %s738_s11, %s73_s17  }
  0x36   : > { %p635_p7 = scmp.ne.s32.totalorder %s886_s7, %s634_s16  ;;  %p636_p12 = pneg %p1045_p8 }
  0x37   : > { %s639_s3 = scalar_lea.hbm %s1027_s1, 8192  ;;  %p640_p2 = scmp.lt.u32.totalorder %s886_s7, %s1027_s1 }
  0x38   : > { %p637_p13 = pnand %p636_p12, %p635_p7  ;;  %p641_p6 = scmp.lt.u32.totalorder %s639_s3, %s634_s16 }
  0x39   : > { %p643_p10 = scmp.lt.u32.totalorder %s634_s16, %s886_s7 }
  0x3a   : > { %p638_p4 = pneg %p637_p13  ;;  %p642_p5 = por %p641_p6, %p640_p2 }
  0x3c   : > { %p644_p11 = por %p643_p10, %p642_p5 }
  0x3e   : > { %p645_p1 = pnand %p644_p11, %p638_p4 }
  0x40   : > { %648 = shalt.err (!%p645_p1)
}
  0x41   : > { %s649_s17 = scalar_lea.vmem %s893_s15, 4096  ;;  %s753_s30 = smov [#allocation5]  }
  0x42   : > { %p650_p0 = scmp.ne.s32.totalorder %s893_s15, %s649_s17  ;;  %s654_s27 = sshll.u32 %s753_s30, 4  ;;  %s655_s27 = int_to_ptr.vmem [resolvable:$false] %s654_s27 }
  0x43   : > { %s656_s6 = scalar_lea.vmem %s655_s27, 8192  ;;  %p657_p7 = scmp.lt.s32.totalorder %s893_s15, %s655_s27 }
  0x44   : > { %p652_p9 = pnand %p650_p0, %p636_p12  ;;  %p658_p13 = scmp.lt.s32.totalorder %s656_s6, %s649_s17 }
  0x46   : > { %p653_p3 = pneg %p652_p9  ;;  %p659_p2 = por %p658_p13, %p657_p7 }
  0x48   : > { %p660_p6 = pnand %p659_p2, %p653_p3 }
  0x4a   : > { %663 = shalt.err (!%p660_p6)
}
  0x4b   : > { %s754_s8 = smov 128   ;;  %s755_s16 = smov 8  }
  0x4c   : > { %546 = dma.hbm_to_vmem [thread:$0]  (!%p1045_p8), %s886_s7, 4096, %s893_s15, %s895_s29, %s754_s8, %s754_s8, %s755_s16  }
  0x4d   : > { %p1046_p12 = scmp.ne.s32.totalorder %s1040_s23, 0 }
  0x4e   : > { %p1047_p4 = scmp.ne.s32.totalorder (!%p1046_p12), %s1035_s18, 0 }
  0x4f   : > { %177 = sbr.rel (%p1046_p12) target bundleno = 355 (0x163), region = 28 }
  0x56   : > { %717 = dma.done.wait (%p1047_p4), [#allocation3], 256  }
  0x57   : > { %719 = vsyncadd (%p1047_p4), [#allocation3], 4294967040  ;;  %s930_s19 = sand.u32 1, %s734_s10   ;;  %p1048_p8 = scmp.ne.s32.totalorder %s1037_s20, 0 }
  0x58   : > { %s457_s24 = sshll.u32 %s930_s19, 8  ;;  %s184_s3 = scalar_lea.sflag [#allocation6], %s930_s19 }
  0x59   : > { %s934_s4 = scalar_lea.vmem [#allocation5], %s457_s24 }
  0x5a   : > { %721 = dma.done.wait (%p1048_p8), %s184_s3, 4096  }
  0x5b   : > { %723 = vsyncadd (%p1048_p8), %s184_s3, 4294963200  ;;  %v231_v0 = vld [vmem:[%s934_s4 + $0x80] sm:$0xff]  ;;  %v232_v1 = vld [vmem:[%s934_s4 + $0x88] sm:$0xff]  ;;  %s458_s18 = sshll.u32 %s930_s19, 3  ;;  %s460_s20 = sshll.u32 %s742_s12, 7 }
  0x5c   : > { %v215_v2 = vld [vmem:[%s934_s4] sm:$0xff]  ;;  %v499_v3 = vpack.c.bf16 %v232_v1, %v231_v0  ;;  %v216_v4 = vld [vmem:[%s934_s4 + $0x8] sm:$0xff]  ;;  %v233_v5 = vld [vmem:[%s934_s4 + $0x90] sm:$0xff]  ;;  %s207_s23 = scalar_lea.vmem [#allocation7], %s458_s18  ;;  %s977_s29 = scalar_lea.hbm %s1028_s2, %s460_s20 }
  0x5d   : > { %v234_v6 = vld [vmem:[%s934_s4 + $0x98] sm:$0xff]  ;;  %v501_v7 = vpack.c.bf16 %v216_v4, %v215_v2  ;;  %v217_v9 = vld [vmem:[%s934_s4 + $0x10] sm:$0xff]  ;;  %v235_v11 = vld [vmem:[%s934_s4 + $0xa0] sm:$0xff]  ;;  %s345_s26 = sshll.u32 %s207_s23, 4  ;;  %s330_s5 = scalar_lea.sflag [#allocation4], %s930_s19  ;;  %s979_s26 = int_to_ptr.vmem [resolvable:$true] %s345_s26 }
  0x5e   : > { %v503_v8 = vpack.c.bf16 %v234_v6, %v233_v5  ;;  %v218_v10 = vld [vmem:[%s934_s4 + $0x18] sm:$0xff]  ;;  %500 = vmatprep.subr.bf16.mxu0 %v499_v3  ;;  %v236_v12 = vld [vmem:[%s934_s4 + $0xa8] sm:$0xff]  ;;  %v219_v15 = vld [vmem:[%s934_s4 + $0x20] sm:$0xff]  ;;  %s664_s17 = scalar_lea.vmem %s979_s26, 128  ;;  %p1049_p10 = scmp.ne.s32.totalorder %s1038_s21, 0 }
  0x5f   : > { %502 = vmatpush3.bf16.msra.mxu0 %v501_v7  ;;  %v505_v13 = vpack.c.bf16 %v218_v10, %v217_v9  ;;  %v507_v14 = vpack.c.bf16 %v236_v12, %v235_v11  ;;  %v220_v16 = vld [vmem:[%s934_s4 + $0x28] sm:$0xff]  ;;  %v237_v17 = vld [vmem:[%s934_s4 + $0xb0] sm:$0xff]  ;;  %v238_v18 = vld [vmem:[%s934_s4 + $0xb8] sm:$0xff]  ;;  %p665_p5 = scmp.ne.s32.totalorder %s979_s26, %s664_s17  ;;  %s756_s12 = smov [#allocation7]  }
  0x60   : > { %504 = vmatprep.subr.bf16.mxu0 %v503_v8  ;;  %v509_v19 = vpack.c.bf16 %v220_v16, %v219_v15  ;;  %v511_v20 = vpack.c.bf16 %v238_v18, %v237_v17  ;;  %v221_v21 = vld [vmem:[%s934_s4 + $0x30] sm:$0xff]  ;;  %v222_v22 = vld [vmem:[%s934_s4 + $0x38] sm:$0xff]  ;;  %v239_v23 = vld [vmem:[%s934_s4 + $0xc0] sm:$0xff]  ;;  %s668_s30 = sshll.u32 %s756_s12, 4  ;;  %s669_s30 = int_to_ptr.vmem [resolvable:$false] %s668_s30 }
  0x61   : > { %v240_v24 = vld [vmem:[%s934_s4 + $0xc8] sm:$0xff]  ;;  %v214_v25 = vld [vmem:[#allocation2 + $0x8] sm:$0xff]  ;;  %v513_v26 = vpack.c.bf16 %v222_v22, %v221_v21  ;;  %v223_v28 = vld [vmem:[%s934_s4 + $0x40] sm:$0xff]  ;;  %p666_p11 = pnand %p665_p5, %p1049_p10  ;;  %s670_s27 = scalar_lea.vmem %s669_s30, 256 }
  0x62   : > { %311 = vmatprep.mubr.f32.mxu0 %v214_v25  ;;  %v515_v27 = vpack.c.bf16 %v240_v24, %v239_v23  ;;  %v224_v29 = vld [vmem:[%s934_s4 + $0x48] sm:$0xff]  ;;  %v241_v30 = vld [vmem:[%s934_s4 + $0xd0] sm:$0xff]  ;;  %v242_v31 = vld [vmem:[%s934_s4 + $0xd8] sm:$0xff]  ;;  %p671_p0 = scmp.lt.s32.totalorder %s979_s26, %s669_s30  ;;  %p672_p9 = scmp.lt.s32.totalorder %s670_s27, %s664_s17 }
  0x63   : > { %506 = vmatpush3.bf16.msra.mxu0 %v505_v13  ;;  %v517_v32 = vpack.c.bf16 %v224_v29, %v223_v28  ;;  %v519_v33 = vpack.c.bf16 %v242_v31, %v241_v30  ;;  %v225_v34 = vld [vmem:[%s934_s4 + $0x50] sm:$0xff]  ;;  %v226_v35 = vld [vmem:[%s934_s4 + $0x58] sm:$0xff]  ;;  %v243_v36 = vld [vmem:[%s934_s4 + $0xe0] sm:$0xff]  ;;  %p667_p1 = pneg %p666_p11 }
  0x64   : > { %508 = vmatprep.subr.bf16.mxu0 %v507_v14  ;;  %v244_v37 = vld [vmem:[%s934_s4 + $0xe8] sm:$0xff]  ;;  %v521_v38 = vpack.c.bf16 %v226_v35, %v225_v34  ;;  %v227_v40 = vld [vmem:[%s934_s4 + $0x60] sm:$0xff]  ;;  %v245_v42 = vld [vmem:[%s934_s4 + $0xf0] sm:$0xff]  ;;  %p673_p3 = por %p672_p9, %p671_p0 }
  0x65   : > { %v523_v39 = vpack.c.bf16 %v244_v37, %v243_v36  ;;  %v228_v41 = vld [vmem:[%s934_s4 + $0x68] sm:$0xff]  ;;  %v246_v43 = vld [vmem:[%s934_s4 + $0xf8] sm:$0xff]  ;;  %v229_v46 = vld [vmem:[%s934_s4 + $0x70] sm:$0xff] }
  0x66   : > { %v525_v44 = vpack.c.bf16 %v228_v41, %v227_v40  ;;  %v527_v45 = vpack.c.bf16 %v246_v43, %v245_v42  ;;  %v230_v47 = vld [vmem:[%s934_s4 + $0x78] sm:$0xff]  ;;  %v213_v49 = vld [vmem:[#allocation2] sm:$0xff]  ;;  %p674_p7 = pnand %p673_p3, %p667_p1 }
  0x67   : > { %510 = vmatpush3.bf16.msra.mxu0 %v509_v19  ;;  %v529_v48 = vpack.c.bf16 %v230_v47, %v229_v46 }
  0x68   : > { %512 = vmatprep.subr.bf16.mxu0 %v511_v20 }
  0x6b   : > { %514 = vmatpush3.bf16.msra.mxu0 %v513_v26 }
  0x6c   : > { %516 = vmatprep.subr.bf16.mxu0 %v515_v27 }
  0x6f   : > { %518 = vmatpush3.bf16.msra.mxu0 %v517_v32 }
  0x70   : > { %520 = vmatprep.subr.bf16.mxu0 %v519_v33 }
  0x73   : > { %522 = vmatpush3.bf16.msra.mxu0 %v521_v38 }
  0x74   : > { %524 = vmatprep.subr.bf16.mxu0 %v523_v39 }
  0x77   : > { %526 = vmatpush3.bf16.msra.mxu0 %v525_v44 }
  0x78   : > { %528 = vmatprep.subr.bf16.mxu0 %v527_v45 }
  0x7b   : > { %530 = vmatpush3.bf16.msra.mxu0 %v529_v48 }
  0x7e   : > { %312 = vmatmul.mubr.f32.vlgmr.msra.gmra.mrb[0].mxu0 %v213_v49 }
 0x151   : > { %v496_v50 = vpop.f32.mrb[0].mxu0 }
 0x152   : > { %v497_v51 = vpop.f32.mrb[1].mxu0 }
 0x153   : > { %v498_v52 = vadd.f32 %v497_v51, %v496_v50 }
 0x155   : > { %321 = vst [vmem:[%s207_s23] sm:$0xff] %v498_v52 }
 0x156   : > { %677 = shalt.err (!%p674_p7)
}
 0x157   : > { %s678_s6 = scalar_lea.hbm %s977_s29, 128  ;;  %s682_s19 = scalar_lea.hbm %s1028_s2, 256 }
 0x158   : > { %p679_p13 = scmp.ne.s32.totalorder %s977_s29, %s678_s6  ;;  %p683_p12 = scmp.lt.u32.totalorder %s977_s29, %s1028_s2 }
 0x159   : > { %p684_p4 = scmp.lt.u32.totalorder %s682_s19, %s678_s6  ;;  %p686_p5 = scmp.lt.u32.totalorder %s678_s6, %s977_s29 }
 0x15a   : > { %p680_p2 = pnand %p679_p13, %p1049_p10 }
 0x15b   : > { %p685_p8 = por %p684_p4, %p683_p12 }
 0x15c   : > { %p681_p6 = pneg %p680_p2 }
 0x15d   : > { %p687_p11 = por %p686_p5, %p685_p8 }
 0x15f   : > { %p688_p1 = pnand %p687_p11, %p681_p6 }
 0x161   : > { %691 = shalt.err (!%p688_p1)
}
 0x162   : > { %537 = dma.vmem_to_hbm [thread:$0]  (%p1049_p10), %s979_s26, 128, %s977_s29, %s330_s5  }
 0x163 PF: > { %s357_s4 = sand.u32 1, %s730_s9   ;;  %p1050_p0 = scmp.ne.s32.totalorder %s1039_s22, 0 }
 0x164   : > { %p1051_p9 = scmp.ge.s32.totalorder %s750_s14, 2  ;;  %s358_s18 = scalar_lea.sflag [#allocation4], %s357_s4 }
 0x166   : > { %p548_p3 = pnand %p1051_p9, %p1050_p0 }
 0x168   : > { %725 = dma.done.wait (!%p548_p3), %s358_s18, 128  }
 0x169   : > { %727 = vsyncadd (!%p548_p3), %s358_s18, 4294967168  ;;  %s19_s14 = sadd.s32 1, %s750_s14   ;;  %s1052_s9 = smov %s734_s10 }
 0x16a   : > { %p16_p7 = scmp.ge.s32.totalorder %s19_s14, 4   ;;  %s1053_s10 = smov %s738_s11 }
 0x16b   : > { %s1054_s11 = smov %s891_s25  ;;  %s1055_s12 = smov %s746_s13 }
 0x16c   : > { %s1056_s13 = smov %s1058_s28  ;;  %18 = sbr.rel (!%p16_p7) target bundleno = 7 (0x7), region = 88 }
 0x173   :  { %363 = vsyncpa [#allocation3], 1 }
 0x174   :  { %365 = vsyncpa [#allocation3 + $0x1], 1 }
 0x175   :  { %366 = vsyncpa [#allocation6], 1 }
 0x176   :  { %368 = vsyncpa [#allocation6 + $0x1], 1 }
 0x177   :  { %369 = vsyncpa [#allocation4], 1 }
 0x178   :  { %371 = vsyncpa [#allocation4 + $0x1], 1 }

</bundles_post_ra>
